<compile_context>
chip_gen: v6e
topology: v6e:2x2x1
jax: 0.10.0
libtpu: 0.0.40
codegen_flags: <defaults>
</compile_context>

<pallas_src>
import functools

import jax
import jax.numpy as jnp
from jax.experimental import pallas as pl
from jax.experimental.pallas import tpu as pltpu


def _vector_dropout_kernel(seed_ref, u_ref, v_ref, uo_ref, vo_ref, *,
                           threshold, inv_keep, block_rows, lane_width):
    shape = (block_rows, lane_width)

    # Global element index of each lane in this tile (uint32, wraparound ok:
    # it is only a hash input).
    row = jax.lax.broadcasted_iota(jnp.uint32, shape, 0)
    col = jax.lax.broadcasted_iota(jnp.uint32, shape, 1)
    base_row = (pl.program_id(0) * block_rows).astype(jnp.uint32)
    idx = (base_row + row) * jnp.uint32(lane_width) + col

    # Stateless splitmix32-style mix of (seed, index) -> uniform u32 bits.
    seed_u = seed_ref[0].astype(jnp.uint32)
    x = idx ^ (seed_u * jnp.uint32(0x9E3779B9))
    x = (x ^ (x >> 16)) * jnp.uint32(0x7FEB352D)
    x = (x ^ (x >> 15)) * jnp.uint32(0x846CA68B)
    x = x ^ (x >> 16)

    # Bernoulli(keep_prob) via integer threshold; inverted-dropout scaling.
    keep = x < jnp.uint32(threshold)
    mask = jnp.where(keep, jnp.float32(inv_keep), jnp.float32(0.0))

    # Synchronized application of the SAME mask to both tensors.
    uo_ref[...] = (u_ref[...].astype(jnp.float32) * mask).astype(uo_ref.dtype)
    vo_ref[...] = (v_ref[...].astype(jnp.float32) * mask).astype(vo_ref.dtype)


def _choose_tiling(total, itemsize):
    """Pick (block_rows, lane_width): wide lanes, shrink for tiny inputs."""
    sub_min = 8 if itemsize >= 4 else (16 if itemsize == 2 else 32)
    block_rows, lane_width = 128, 1024          # 512 KiB per f32 block
    while block_rows > sub_min and block_rows * lane_width > total:
        block_rows //= 2
    while lane_width > 128 and block_rows * lane_width > total:
        lane_width //= 2
    return block_rows, lane_width


def vector_dropout(u, v, p=0.5, seed=0):
    """Pallas implementation of VectorDropout.forward on (u, v)."""
    assert p < 1.0
    assert u.shape == v.shape, "synchronized dropout assumes matching shapes"
    if p == 0.0:
        return u, v                               # mask is identically 1

    keep_prob = 1.0 - p
    inv_keep = 1.0 / keep_prob
    threshold = min(int(round(keep_prob * (1 << 32))), (1 << 32) - 1)

    total = int(u.size)
    itemsize = jnp.dtype(u.dtype).itemsize
    block_rows, lane_width = _choose_tiling(total, itemsize)
    tile_elems = block_rows * lane_width
    padded_total = pl.cdiv(total, tile_elems) * tile_elems
    rows = padded_total // lane_width
    num_tiles = rows // block_rows

    u_flat = u.reshape(-1)
    v_flat = v.reshape(-1)
    if padded_total != total:
        pad = padded_total - total
        u_flat = jnp.pad(u_flat, (0, pad))
        v_flat = jnp.pad(v_flat, (0, pad))
    u2 = u_flat.reshape(rows, lane_width)
    v2 = v_flat.reshape(rows, lane_width)

    seed_arr = jnp.asarray([seed], dtype=jnp.int32)

    kernel = functools.partial(
        _vector_dropout_kernel,
        threshold=threshold,
        inv_keep=float(inv_keep),
        block_rows=block_rows,
        lane_width=lane_width,
    )

    blk = lambda i, seed: (i, 0)  # noqa: E731  (seed ref passed positionally)
    spec = pl.BlockSpec((block_rows, lane_width), blk)

    cost = pl.CostEstimate(
        flops=10 * padded_total,                      # hash + mask + 2 muls
        transcendentals=0,
        bytes_accessed=4 * padded_total * itemsize,   # 2 reads + 2 writes
    )

    uo2, vo2 = pl.pallas_call(
        kernel,
        out_shape=(
            jax.ShapeDtypeStruct((rows, lane_width), u.dtype),
            jax.ShapeDtypeStruct((rows, lane_width), v.dtype),
        ),
        grid_spec=pltpu.PrefetchScalarGridSpec(
            num_scalar_prefetch=1,            # seed -> SMEM
            grid=(num_tiles,),
            in_specs=[spec, spec],
            out_specs=(spec, spec),
        ),
        compiler_params=pltpu.CompilerParams(
            dimension_semantics=("parallel",),
        ),
        cost_estimate=cost,
    )(seed_arr, u2, v2)

    uo = uo2.reshape(-1)[:total].reshape(u.shape)
    vo = vo2.reshape(-1)[:total].reshape(v.shape)
    return uo, vo


if __name__ == "__main__":
    key = jax.random.PRNGKey(0)
    k1, k2 = jax.random.split(key)

    # Small NCHW shapes consistent with the module's usage.
    u = jax.random.normal(k1, (2, 4, 16, 16), dtype=jnp.float32)
    v = jax.random.normal(k2, (2, 4, 16, 16), dtype=jnp.float32)

    p = 0.5
    uo, vo = vector_dropout(u, v, p=p, seed=1234)
    jax.block_until_ready((uo, vo))

    # Sanity checks on the synchronized-dropout semantics:
    scale = 1.0 / (1.0 - p)
    zero_u = (uo == 0.0)
    zero_v = (vo == 0.0)
    # Wherever u's output was zeroed (and u was nonzero), v's output must be too.
    dropped = zero_u & (u != 0.0)
    assert bool(jnp.all(jnp.where(dropped, zero_v, True))), "masks not synchronized"
    # Kept elements are scaled by exactly 1/(1-p).
    kept = ~zero_u & (u != 0.0)
    ratio_u = jnp.where(kept, uo / jnp.where(u != 0.0, u, 1.0), scale)
    assert bool(jnp.allclose(ratio_u, scale, atol=1e-5)), "kept scale mismatch"
    # Drop fraction should be roughly p (loose bound, ~2048 samples).
    frac_dropped = float(jnp.mean(dropped.astype(jnp.float32)))
    assert 0.35 < frac_dropped < 0.65, f"drop fraction {frac_dropped} far from p={p}"

    print("KERNEL_OK")
</pallas_src>

<mosaic_0001>
module attributes {stable_mosaic.version = 11 : i64} {
  func.func @_vector_dropout_kernel(%arg0: i32, %arg1: memref<1xi32, #tpu.memory_space<smem>>, %arg2: memref<8x256xf32, #tpu.memory_space<vmem>>, %arg3: memref<8x256xf32, #tpu.memory_space<vmem>>, %arg4: memref<8x256xf32, #tpu.memory_space<vmem>>, %arg5: memref<8x256xf32, #tpu.memory_space<vmem>>) attributes {dimension_semantics = [#tpu.dimension_semantics<parallel>], iteration_bounds = array<i64: 1>, scalar_prefetch = 1 : i64, scratch_operands = 0 : i64, tpu.core_type = #tpu.core_type<tc>, window_params = [{transform_indices = @transform_0, window_bounds = array<i64: 8, 256>}, {transform_indices = @transform_1, window_bounds = array<i64: 8, 256>}, {transform_indices = @transform_2, window_bounds = array<i64: 8, 256>}, {transform_indices = @transform_3, window_bounds = array<i64: 8, 256>}]} {
    %0 = tpu.iota {dimensions = array<i32: 0>} : vector<8x256xi32>
    %1 = tpu.iota {dimensions = array<i32: 1>} : vector<8x256xi32>
    %c8_i32 = arith.constant 8 : i32
    %2 = arith.muli %arg0, %c8_i32 : i32
    %3 = vector.broadcast %2 : i32 to vector<8x256xi32>
    %4 = arith.addi %3, %0 : vector<8x256xi32>
    %c256_i32 = arith.constant 256 : i32
    %5 = vector.broadcast %c256_i32 : i32 to vector<8x256xi32>
    %6 = arith.muli %4, %5 : vector<8x256xi32>
    %7 = arith.addi %6, %1 : vector<8x256xi32>
    %c0 = arith.constant 0 : index
    %8 = memref.load %arg1[%c0] : memref<1xi32, #tpu.memory_space<smem>>
    %c-1640531527_i32 = arith.constant -1640531527 : i32
    %9 = arith.muli %8, %c-1640531527_i32 : i32
    %10 = vector.broadcast %9 : i32 to vector<8x256xi32>
    %11 = arith.xori %7, %10 : vector<8x256xi32>
    %c16_i32 = arith.constant 16 : i32
    %12 = vector.broadcast %c16_i32 : i32 to vector<8x256xi32>
    %13 = arith.shrui %11, %12 : vector<8x256xi32>
    %14 = arith.xori %11, %13 : vector<8x256xi32>
    %c2146121005_i32 = arith.constant 2146121005 : i32
    %15 = vector.broadcast %c2146121005_i32 : i32 to vector<8x256xi32>
    %16 = arith.muli %14, %15 : vector<8x256xi32>
    %c15_i32 = arith.constant 15 : i32
    %17 = vector.broadcast %c15_i32 : i32 to vector<8x256xi32>
    %18 = arith.shrui %16, %17 : vector<8x256xi32>
    %19 = arith.xori %16, %18 : vector<8x256xi32>
    %c-2073254261_i32 = arith.constant -2073254261 : i32
    %20 = vector.broadcast %c-2073254261_i32 : i32 to vector<8x256xi32>
    %21 = arith.muli %19, %20 : vector<8x256xi32>
    %c16_i32_0 = arith.constant 16 : i32
    %22 = vector.broadcast %c16_i32_0 : i32 to vector<8x256xi32>
    %23 = arith.shrui %21, %22 : vector<8x256xi32>
    %24 = arith.xori %21, %23 : vector<8x256xi32>
    %c-2147483648_i32 = arith.constant -2147483648 : i32
    %25 = vector.broadcast %c-2147483648_i32 : i32 to vector<8x256xi32>
    %26 = arith.cmpi ult, %24, %25 : vector<8x256xi32>
    %cst = arith.constant 2.000000e+00 : f32
    %cst_1 = arith.constant 0.000000e+00 : f32
    %27 = vector.broadcast %cst : f32 to vector<8x256xf32>
    %28 = vector.broadcast %cst_1 : f32 to vector<8x256xf32>
    %29 = arith.select %26, %27, %28 : vector<8x256xi1>, vector<8x256xf32>
    %c0_2 = arith.constant 0 : index
    %c0_3 = arith.constant 0 : index
    %30 = vector.load %arg2[%c0_2, %c0_3] : memref<8x256xf32, #tpu.memory_space<vmem>>, vector<8x256xf32>
    %31 = arith.mulf %30, %29 : vector<8x256xf32>
    %c0_4 = arith.constant 0 : index
    %c0_5 = arith.constant 0 : index
    %32 = vector.load %arg4[%c0_4, %c0_5] : memref<8x256xf32, #tpu.memory_space<vmem>>, vector<8x256xf32>
    tpu.vector_store %arg4[%c0_4, %c0_5], %31 {strides = array<i32>} : memref<8x256xf32, #tpu.memory_space<vmem>>, vector<8x256xf32>,
    %c0_6 = arith.constant 0 : index
    %c0_7 = arith.constant 0 : index
    %33 = vector.load %arg3[%c0_6, %c0_7] : memref<8x256xf32, #tpu.memory_space<vmem>>, vector<8x256xf32>
    %34 = arith.mulf %33, %29 : vector<8x256xf32>
    %c0_8 = arith.constant 0 : index
    %c0_9 = arith.constant 0 : index
    %35 = vector.load %arg5[%c0_8, %c0_9] : memref<8x256xf32, #tpu.memory_space<vmem>>, vector<8x256xf32>
    tpu.vector_store %arg5[%c0_8, %c0_9], %34 {strides = array<i32>} : memref<8x256xf32, #tpu.memory_space<vmem>>, vector<8x256xf32>,
    return
  }
  func.func @transform_0(%arg0: i32, %arg1: memref<1xi32, #tpu.memory_space<smem>>) -> (i32, i32) {
    %c0_i32 = arith.constant 0 : i32
    %c0_i32_0 = arith.constant 0 : i32
    return %arg0, %c0_i32 : i32, i32
  }
  func.func @transform_1(%arg0: i32, %arg1: memref<1xi32, #tpu.memory_space<smem>>) -> (i32, i32) {
    %c0_i32 = arith.constant 0 : i32
    %c0_i32_0 = arith.constant 0 : i32
    return %arg0, %c0_i32 : i32, i32
  }
  func.func @transform_2(%arg0: i32, %arg1: memref<1xi32, #tpu.memory_space<smem>>) -> (i32, i32) {
    %c0_i32 = arith.constant 0 : i32
    %c0_i32_0 = arith.constant 0 : i32
    return %arg0, %c0_i32 : i32, i32
  }
  func.func @transform_3(%arg0: i32, %arg1: memref<1xi32, #tpu.memory_space<smem>>) -> (i32, i32) {
    %c0_i32 = arith.constant 0 : i32
    %c0_i32_0 = arith.constant 0 : i32
    return %arg0, %c0_i32 : i32, i32
  }
}

</mosaic_0001>

<bundles_post_ra>
// kernel: tpu_custom_call.1
= control target key start
LH: loop header
LB: loop body
LE: loop exit
PB: predicated region body
PF: predicated region fallthrough
CT: control target
= control target key end

     0   :  { %11 = vsyncpa [#allocation5], 0  ;;  %s257_s0 = inlined_call_operand.<no memory space> [shape: s32[1], index: 0, kind: input, shape index: {}]   ;;  %s258_s1 = inlined_call_operand.hbm [shape: f32[8,256], index: 1, kind: input, shape index: {}]   ;;  %s259_s2 = inlined_call_operand.hbm [shape: f32[8,256], index: 2, kind: input, shape index: {}]   ;;  %s260_s3 = inlined_call_operand.hbm [shape: f32[8,256], index: 3, kind: output, shape index: {0}]   ;;  %s261_s4 = inlined_call_operand.hbm [shape: f32[8,256], index: 4, kind: output, shape index: {1}]  }
   0x1   :  { %12 = vsyncpa [#allocation8], 0 }
   0x2   :  { %13 = vsyncpa [#allocation6], 0 }
   0x3   :  { %14 = vsyncpa [#allocation11], 0  ;;  %s212_s15 = smov [#allocation4]   ;;  %s213_s17 = smov [#allocation7]  }
   0x4   :  { %s21_s16 = sshll.u32 %s212_s15, 4  ;;  %s31_s18 = sshll.u32 %s213_s17, 4  ;;  %s22_s16 = int_to_ptr.vmem [resolvable:$true] %s21_s16  ;;  %s32_s18 = int_to_ptr.vmem [resolvable:$true] %s31_s18 }
   0x5   :  { %s132_s19 = scalar_lea.vmem %s22_s16, 256  ;;  %p137_p1 = scmp.lt.s32.totalorder %s22_s16, %s22_s16 }
   0x6   :  { %p133_p0 = scmp.ne.s32.totalorder %s22_s16, %s132_s19  ;;  %p138_p2 = scmp.lt.s32.totalorder %s132_s19, %s132_s19 }
   0x8   :  { %p139_p3 = por %p138_p2, %p137_p1 }
   0xa   :  { %p140_p4 = pnand %p139_p3, %p133_p0 }
   0xc   :  { %143 = shalt.err (!%p140_p4)
}
   0xd   :  { %24 = dma.hbm_to_vmem [thread:$0]  %s258_s1, 256, %s22_s16, [#allocation5]  }
   0xe   :  { %s152_s22 = scalar_lea.vmem %s32_s18, 256  ;;  %p157_p6 = scmp.lt.s32.totalorder %s32_s18, %s32_s18 }
   0xf   :  { %p153_p5 = scmp.ne.s32.totalorder %s32_s18, %s152_s22  ;;  %p158_p7 = scmp.lt.s32.totalorder %s152_s22, %s152_s22 }
  0x11   :  { %p159_p8 = por %p158_p7, %p157_p6 }
  0x13   :  { %p160_p9 = pnand %p159_p8, %p153_p5 }
  0x15   :  { %163 = shalt.err (!%p160_p9)
}
  0x16   :  { %34 = dma.hbm_to_vmem [thread:$0]  %s259_s2, 256, %s32_s18, [#allocation8]  }
  0x17   :  { %204 = dma.done.wait [#allocation5], 256  }
  0x18   :  { %205 = vsyncadd [#allocation5], 4294967040 }
  0x19   :  { %206 = dma.done.wait [#allocation8], 256  }
  0x1a   :  { %207 = vsyncadd [#allocation8], 4294967040  ;;  %v41_v0 = vlaneseq  ;;  %s53_s1 = smul.u32 2654435769, %s257_s0  ;;  %v77_v25 = vld [vmem:[#allocation4] sm:$0xff]  ;;  %v78_v27 = vld [vmem:[#allocation4 + $0x8] sm:$0xff] }
  0x1b   :  { %v83_v28 = vld [vmem:[#allocation7] sm:$0xff]  ;;  %v84_v29 = vld [vmem:[#allocation7 + $0x8] sm:$0xff]  ;;  %s214_s0 = smov [#allocation9]   ;;  %s215_s27 = smov [#allocation10]   ;;  %v216_v30 = vmov 0.0  }
  0x1c   :  { %v42_v1 = vshrl.u32 %v41_v0, 7  ;;  %v44_v2 = vand.u32 127, %v41_v0  ;;  %v54_v5 = vstv %s53_s1  ;;  %s95_s2 = sshll.u32 %s214_s0, 4  ;;  %s105_s28 = sshll.u32 %s215_s27, 4  ;;  %s96_s2 = int_to_ptr.vmem [resolvable:$true] %s95_s2  ;;  %s106_s28 = int_to_ptr.vmem [resolvable:$true] %s105_s28 }
  0x1d   :  { %s164_s29 = scalar_lea.vmem %s96_s2, 256  ;;  %p169_p11 = scmp.lt.s32.totalorder %s96_s2, %s96_s2 }
  0x1e   :  { %v49_v3 = vmul.u32 256, %v42_v1  ;;  %v45_v4 = vadd.s32 128, %v44_v2  ;;  %p165_p10 = scmp.ne.s32.totalorder %s96_s2, %s164_s29  ;;  %p170_p12 = scmp.lt.s32.totalorder %s164_s29, %s164_s29 }
  0x20   :  { %v50_v6 = vadd.s32 %v49_v3, %v44_v2  ;;  %v51_v7 = vadd.s32 %v49_v3, %v45_v4  ;;  %p171_p13 = por %p170_p12, %p169_p11 }
  0x22   :  { %v55_v8 = vxor.u32 %v54_v5, %v50_v6  ;;  %v56_v9 = vxor.u32 %v54_v5, %v51_v7  ;;  %p172_p0 = pnand %p171_p13, %p165_p10 }
  0x24   :  { %v57_v10 = vshrl.u32 %v55_v8, 16  ;;  %v58_v11 = vshrl.u32 %v56_v9, 16 }
  0x26   :  { %v59_v12 = vxor.u32 %v57_v10, %v55_v8  ;;  %v60_v13 = vxor.u32 %v58_v11, %v56_v9 }
  0x28   :  { %v61_v14 = vmul.u32 2146121005, %v59_v12  ;;  %v62_v15 = vmul.u32 2146121005, %v60_v13 }
  0x2a   :  { %v63_v16 = vshrl.u32 %v61_v14, 15  ;;  %v64_v17 = vshrl.u32 %v62_v15, 15 }
  0x2c   :  { %v65_v18 = vxor.u32 %v63_v16, %v61_v14  ;;  %v66_v19 = vxor.u32 %v64_v17, %v62_v15 }
  0x2e   :  { %v67_v20 = vmul.u32 2221713035, %v65_v18  ;;  %v68_v21 = vmul.u32 2221713035, %v66_v19 }
  0x30   :  { %v69_v22 = vshrl.u32 %v67_v20, 16  ;;  %v70_v23 = vshrl.u32 %v68_v21, 16 }
  0x32   :  { %v71_v24 = vxor.u32 %v69_v22, %v67_v20  ;;  %v72_v26 = vxor.u32 %v70_v23, %v68_v21 }
  0x34   :  { %vm73_vm0 = vcmp.lt.u32.totalorder %v71_v24, 2147483648  ;;  %vm74_vm1 = vcmp.lt.u32.totalorder %v72_v26, 2147483648 }
  0x35   :  { %v75_v31 = vsel %vm73_vm0, 2.0, %v216_v30  ;;  %v76_v32 = vsel %vm74_vm1, 2.0, %v216_v30 }
  0x36   :  { %v79_v33 = vmul.f32 %v77_v25, %v75_v31  ;;  %v80_v34 = vmul.f32 %v78_v27, %v76_v32  ;;  %v85_v35 = vmul.f32 %v83_v28, %v75_v31  ;;  %v86_v36 = vmul.f32 %v84_v29, %v76_v32 }
  0x38   :  { %81 = vst [vmem:[#allocation9] sm:$0xff] %v79_v33  ;;  %82 = vst [vmem:[#allocation9 + $0x8] sm:$0xff] %v80_v34 }
  0x39   :  { %87 = vst [vmem:[#allocation10] sm:$0xff] %v85_v35  ;;  %88 = vst [vmem:[#allocation10 + $0x8] sm:$0xff] %v86_v36 }
  0x3a   :  { %175 = shalt.err (!%p172_p0)
}
  0x3b   :  { %98 = dma.vmem_to_hbm [thread:$0]  %s96_s2, 256, %s260_s3, [#allocation6]  }
  0x3c   :  { %s184_s6 = scalar_lea.vmem %s106_s28, 256  ;;  %p189_p2 = scmp.lt.s32.totalorder %s106_s28, %s106_s28 }
  0x3d   :  { %p185_p1 = scmp.ne.s32.totalorder %s106_s28, %s184_s6  ;;  %p190_p3 = scmp.lt.s32.totalorder %s184_s6, %s184_s6 }
  0x3f   :  { %p191_p4 = por %p190_p3, %p189_p2 }
  0x41   :  { %p192_p5 = pnand %p191_p4, %p185_p1 }
  0x43   :  { %195 = shalt.err (!%p192_p5)
}
  0x44   :  { %108 = dma.vmem_to_hbm [thread:$0]  %s106_s28, 256, %s261_s4, [#allocation11]  }
  0x45   :  { %208 = dma.done.wait [#allocation6], 256  }
  0x46   :  { %209 = vsyncadd [#allocation6], 4294967040 }
  0x47   :  { %210 = dma.done.wait [#allocation11], 256  }
  0x48   :  { %211 = vsyncadd [#allocation11], 4294967040 }
  0x49   :  { %115 = vsyncpa [#allocation5], 1 }
  0x4a   :  { %116 = vsyncpa [#allocation8], 1 }
  0x4b   :  { %117 = vsyncpa [#allocation6], 1 }
  0x4c   :  { %118 = vsyncpa [#allocation11], 1 }

</bundles_post_ra>
